<compile_context>
chip_gen: v7x
topology: tpu7x:2x2x1
jax: 0.10.0
libtpu: 0.0.40
codegen_flags: <defaults>
</compile_context>

<pallas_src>
import functools

import jax
import jax.numpy as jnp
from jax.experimental import pallas as pl
from jax.experimental.pallas import tpu as pltpu


# -----------------------------------------------------------------------------
# Shared link-function math (pure jnp: usable both inside the kernel and in the
# plain-JAX fallback path).
# -----------------------------------------------------------------------------
def _apply_link(z, link_function: str):
    if link_function == "probit":
        # standard normal CDF
        return 0.5 * (1.0 + jax.lax.erf(z * jnp.float32(0.7071067811865476)))
    elif link_function == "cloglog":
        return 1.0 - jnp.exp(-jnp.exp(z))
    else:  # 'logit' -> stable sigmoid
        return jax.nn.sigmoid(z)


# -----------------------------------------------------------------------------
# Pallas kernel: one (K, TILE_M) lane-dense output block per grid step.
# -----------------------------------------------------------------------------
def _clm_kernel(x_ref, th_ref, o_ref, *, num_classes: int, link_function: str):
    K = num_classes
    proj = x_ref[...]                      # (1, tile)      -- batch on lanes
    th = th_ref[...]                       # (K-1, 1)       -- classes on sublanes

    # z[k, i] = thresholds[k] - projected[i]   (outer difference via broadcast)
    z = th - proj                          # (K-1, tile)
    cum = _apply_link(z, link_function)    # cumulative probs P(y <= k), k < K-1

    # Analytic adjacent differences, written as sublane slice stores
    # (lane dimension stays fully dense -> unmasked vector stores).
    o_ref[0:1, :] = cum[0:1, :]
    if K > 2:
        o_ref[1:K - 1, :] = cum[1:, :] - cum[:-1, :]
    o_ref[K - 1:K, :] = 1.0 - cum[K - 2:K - 1, :]


# -----------------------------------------------------------------------------
# Plain-JAX path (tiny batches + reference building block).
# -----------------------------------------------------------------------------
def _clm_jax(proj, th, num_classes: int, link_function: str):
    z3 = th[None, :] - proj[:, None]                    # (m, K-1)
    cum = _apply_link(z3, link_function)
    first = cum[:, :1]
    last = 1.0 - cum[:, -1:]
    if num_classes > 2:
        mid = cum[:, 1:] - cum[:, :-1]
        return jnp.concatenate([first, mid, last], axis=1)
    return jnp.concatenate([first, last], axis=1)


def _convert_thresholds(thresholds_b, thresholds_a, min_distance):
    a = thresholds_a.astype(jnp.float32) ** 2 + jnp.float32(min_distance)
    th_param = jnp.concatenate([thresholds_b.astype(jnp.float32), a], axis=0)
    return jnp.cumsum(th_param)                          # (K-1,) monotone thresholds


# -----------------------------------------------------------------------------
# Public forward.
# -----------------------------------------------------------------------------
def clm_forward(x,
                thresholds_b,
                thresholds_a,
                num_classes: int,
                link_function: str = "logit",
                min_distance: float = 0.0,
                *,
                tile_m: int = 8192,
                min_rows_for_pallas: int = 512):
    """JAX/Pallas equivalent of CLM.forward.

    x:            any shape; flattened to (m,) projected values (as in PyTorch).
    thresholds_b: shape (1,)    -- first threshold parameter.
    thresholds_a: shape (K-2,)  -- alpha parameters for remaining thresholds.
    Returns (m, num_classes) float32 class probabilities.
    """
    K = num_classes
    proj = jnp.reshape(x, (-1,)).astype(jnp.float32)     # (m,)
    m = proj.shape[0]

    # Tiny scalar glue: parameter -> monotone thresholds (plain JAX).
    th = _convert_thresholds(thresholds_b, thresholds_a, min_distance)  # (K-1,)

    # Tiny batches: launch overhead > work, use the plain-JAX path.
    if m < min_rows_for_pallas:
        return _clm_jax(proj, th, K, link_function)

    # Lane-dense working layout: batch on lanes, classes on sublanes.
    proj_t = proj.reshape(1, m)                          # (1, m)
    th_t = th.reshape(K - 1, 1)                          # (K-1, 1)

    # Tile the batch axis. A single block (tile == m) is exempt from the
    # 128-divisibility rule; multi-block tiles must be multiples of 128.
    tile = min(tile_m, m)
    if tile < m:
        tile = max(128, (tile // 128) * 128)
    grid = (pl.cdiv(m, tile),)

    kernel = functools.partial(_clm_kernel, num_classes=K,
                               link_function=link_function)

    out_t = pl.pallas_call(
        kernel,
        out_shape=jax.ShapeDtypeStruct((K, m), jnp.float32),
        grid=grid,
        in_specs=[
            pl.BlockSpec((1, tile), lambda i: (0, i)),       # proj: tiled over m
            pl.BlockSpec((K - 1, 1), lambda i: (0, 0)),      # thresholds: resident
        ],
        out_specs=pl.BlockSpec((K, tile), lambda i: (0, i)),  # lane-dense (K, m)
        compiler_params=pltpu.CompilerParams(
            dimension_semantics=("parallel",)),
    )(proj_t, th_t)

    return out_t.T                                          # (m, K) for the caller


# -----------------------------------------------------------------------------
# Pure-JAX reference mirroring the PyTorch semantics (independent check).
# -----------------------------------------------------------------------------
def _clm_reference(x, thresholds_b, thresholds_a, num_classes, link_function,
                   min_distance):
    proj = jnp.reshape(x, (-1,)).astype(jnp.float32)
    th = _convert_thresholds(thresholds_b, thresholds_a, min_distance)
    z3 = th[None, :] - proj[:, None]
    a3T = _apply_link(z3, link_function)
    cum = jnp.concatenate([a3T, jnp.ones((proj.shape[0], 1), jnp.float32)], axis=1)
    return jnp.concatenate([cum[:, :1], cum[:, 1:] - cum[:, :-1]], axis=1)


if __name__ == "__main__":
    num_classes = 5
    min_distance = 0.0

    key = jax.random.PRNGKey(0)
    k_inp, k_w, k_b = jax.random.split(key, 3)

    # Mimic the PyTorch example: inp -> Linear(5, 1) -> CLM, but with a batch
    # big enough to exercise the tiled Pallas path (incl. a partial last tile).
    batch, feat = 1000, 5
    inp = jax.random.normal(k_inp, (batch, feat), dtype=jnp.float32)
    W = jax.random.normal(k_w, (feat, 1), dtype=jnp.float32) * 0.1
    b = jax.random.normal(k_b, (1,), dtype=jnp.float32) * 0.1
    x = inp @ W + b                                       # (batch, 1) projected

    # CLM parameters, deterministic init exactly as in the module's __init__:
    thresholds_b = jnp.array([0.0], dtype=jnp.float32)                  # (1,)
    thresholds_a = jnp.ones((num_classes - 2,), dtype=jnp.float32)      # (K-2,)

    # --- Pallas path: multi-block grid (tile_m=256 -> 4 blocks, last partial) ---
    for link in ("logit", "cloglog"):
        out = clm_forward(x, thresholds_b, thresholds_a, num_classes, link,
                          min_distance, tile_m=256)
        out = jax.block_until_ready(out)
        ref = _clm_reference(x, thresholds_b, thresholds_a, num_classes, link,
                             min_distance)
        assert out.shape == (batch, num_classes)
        assert jnp.allclose(out, ref, atol=1e-5, rtol=1e-5)
        assert jnp.allclose(out.sum(axis=1), jnp.ones((batch,)), atol=1e-5)

    # --- Pallas path: single full-array block (m not a multiple of 128) ---
    out1 = clm_forward(x, thresholds_b, thresholds_a, num_classes, "logit",
                       min_distance)                       # default tile_m >= m
    out1 = jax.block_until_ready(out1)
    ref1 = _clm_reference(x, thresholds_b, thresholds_a, num_classes, "logit",
                          min_distance)
    assert jnp.allclose(out1, ref1, atol=1e-5, rtol=1e-5)

    # --- Tiny-batch fallback path (plain JAX; covers probit too) ---
    x_small = x[:10]
    for link in ("logit", "probit", "cloglog"):
        out_s = clm_forward(x_small, thresholds_b, thresholds_a, num_classes,
                            link, min_distance)
        ref_s = _clm_reference(x_small, thresholds_b, thresholds_a, num_classes,
                               link, min_distance)
        assert out_s.shape == (10, num_classes)
        assert jnp.allclose(out_s, ref_s, atol=1e-5, rtol=1e-5)

    print("KERNEL_OK")
</pallas_src>

<mosaic_0001>
module attributes {stable_mosaic.version = 11 : i64} {
  func.func @_clm_kernel(%arg0: i32, %arg1: memref<1x256xf32, #tpu.memory_space<vmem>>, %arg2: memref<4x1xf32, #tpu.memory_space<vmem>>, %arg3: memref<5x256xf32, #tpu.memory_space<vmem>>) attributes {dimension_semantics = [#tpu.dimension_semantics<parallel>], iteration_bounds = array<i64: 4>, scalar_prefetch = 0 : i64, scratch_operands = 0 : i64, tpu.core_type = #tpu.core_type<tc>, window_params = [{transform_indices = @transform_0, window_bounds = array<i64: 1, 256>}, {pipeline_mode = #tpu.pipeline_mode<synchronous>, transform_indices = @transform_1, window_bounds = array<i64: 4, 1>}, {transform_indices = @transform_2, window_bounds = array<i64: 5, 256>}]} {
    %c0 = arith.constant 0 : index
    %c0_0 = arith.constant 0 : index
    %0 = vector.load %arg1[%c0, %c0_0] : memref<1x256xf32, #tpu.memory_space<vmem>>, vector<1x256xf32>
    %c0_1 = arith.constant 0 : index
    %c0_2 = arith.constant 0 : index
    %1 = vector.load %arg2[%c0_1, %c0_2] : memref<4x1xf32, #tpu.memory_space<vmem>>, vector<4x1xf32>
    %2 = vector.broadcast %1 : vector<4x1xf32> to vector<4x256xf32>
    %3 = vector.broadcast %0 : vector<1x256xf32> to vector<4x256xf32>
    %4 = arith.subf %2, %3 : vector<4x256xf32>
    %5 = arith.negf %4 : vector<4x256xf32>
    %6 = math.exp %5 : vector<4x256xf32>
    %cst = arith.constant 1.000000e+00 : f32
    %7 = vector.broadcast %cst : f32 to vector<4x256xf32>
    %8 = arith.addf %7, %6 : vector<4x256xf32>
    %9 = arith.divf %7, %8 : vector<4x256xf32>
    %10 = vector.extract_strided_slice %9 {offsets = [0, 0], sizes = [1, 256], strides = [1, 1]} : vector<4x256xf32> to vector<1x256xf32>
    %c0_3 = arith.constant 0 : index
    %c0_4 = arith.constant 0 : index
    %11 = vector.load %arg3[%c0_3, %c0_4] : memref<5x256xf32, #tpu.memory_space<vmem>>, vector<1x256xf32>
    tpu.vector_store %arg3[%c0_3, %c0_4], %10 {strides = array<i32>} : memref<5x256xf32, #tpu.memory_space<vmem>>, vector<1x256xf32>,
    %12 = vector.extract_strided_slice %9 {offsets = [1, 0], sizes = [3, 256], strides = [1, 1]} : vector<4x256xf32> to vector<3x256xf32>
    %13 = vector.extract_strided_slice %9 {offsets = [0, 0], sizes = [3, 256], strides = [1, 1]} : vector<4x256xf32> to vector<3x256xf32>
    %14 = arith.subf %12, %13 : vector<3x256xf32>
    %c1 = arith.constant 1 : index
    %c0_5 = arith.constant 0 : index
    %15 = vector.load %arg3[%c1, %c0_5] : memref<5x256xf32, #tpu.memory_space<vmem>>, vector<3x256xf32>
    tpu.vector_store %arg3[%c1, %c0_5], %14 {strides = array<i32>} : memref<5x256xf32, #tpu.memory_space<vmem>>, vector<3x256xf32>,
    %16 = vector.extract_strided_slice %9 {offsets = [3, 0], sizes = [1, 256], strides = [1, 1]} : vector<4x256xf32> to vector<1x256xf32>
    %cst_6 = arith.constant 1.000000e+00 : f32
    %17 = vector.broadcast %cst_6 : f32 to vector<1x256xf32>
    %18 = arith.subf %17, %16 : vector<1x256xf32>
    %c4 = arith.constant 4 : index
    %c0_7 = arith.constant 0 : index
    %19 = vector.load %arg3[%c4, %c0_7] : memref<5x256xf32, #tpu.memory_space<vmem>>, vector<1x256xf32>
    tpu.vector_store %arg3[%c4, %c0_7], %18 {strides = array<i32>} : memref<5x256xf32, #tpu.memory_space<vmem>>, vector<1x256xf32>,
    return
  }
  func.func @transform_0(%arg0: i32) -> (i32, i32) {
    %c0_i32 = arith.constant 0 : i32
    %c0_i32_0 = arith.constant 0 : i32
    return %c0_i32, %arg0 : i32, i32
  }
  func.func @transform_1(%arg0: i32) -> (i32, i32) {
    %c0_i32 = arith.constant 0 : i32
    %c0_i32_0 = arith.constant 0 : i32
    %c0_i32_1 = arith.constant 0 : i32
    return %c0_i32, %c0_i32_0 : i32, i32
  }
  func.func @transform_2(%arg0: i32) -> (i32, i32) {
    %c0_i32 = arith.constant 0 : i32
    %c0_i32_0 = arith.constant 0 : i32
    return %c0_i32, %arg0 : i32, i32
  }
}

</mosaic_0001>

<bundles_post_ra>
// kernel: tpu_custom_call.1
= control target key start
LH: loop header
LB: loop body
LE: loop exit
PB: predicated region body
PF: predicated region fallthrough
CT: control target
= control target key end

     0   :  { %7 = vsyncpa [#allocation3], 0  ;;  %s692_s0 = inlined_call_operand.hbm [shape: f32[1,1000], index: 0, kind: input, shape index: {}]   ;;  %s693_s1 = inlined_call_operand.vmem [shape: f32[4,1], index: 1, kind: input, shape index: {}]   ;;  %s694_s2 = inlined_call_operand.hbm [shape: f32[5,1000], index: 2, kind: output, shape index: {}]  }
   0x1   :  { %9 = vsyncpa [#allocation3 + $0x1], 0 }
   0x2   :  { %10 = vsyncpa [#allocation4], 0 }
   0x3   :  { %12 = vsyncpa [#allocation4 + $0x1], 0  ;;  %s529_s9 = smov 0   ;;  %s531_s10 = smov 0  }
   0x4   :  { %s533_s11 = smov 0   ;;  %s535_s12 = smov 0  }
   0x5 LB: > { %s550_s13 = sadd.s32 4294967295, %s508_s12   ;;  %s336_s14 = sadd.s32 4294967294, %s508_s12   ;;  %s508_s12 = sphi %s535_s12, %s708_s12   ;;  %s504_s11 = sphi %s533_s11, %s707_s11   ;;  %s500_s10 = sphi %s531_s10, %s706_s10   ;;  %s496_s9 = sphi %s529_s9, %s705_s9  }
   0x6   : > { %s554_s15 = sadd.s32 1, %s508_s12   ;;  %s25_s16 = sadd.s32 1, %s504_s11 }
   0x7   : > { %s22_s17 = ssub.s32 %s508_s12, %s554_s15  ;;  %p32_p0 = scmp.ne.s32.totalorder %s504_s11, %s500_s10 }
   0x8   : > { %p23_p1 = scmp.eq.s32.totalorder %s22_s17, 0  ;;  %p33_p2 = scmp.eq.s32.totalorder %s508_s12, 0 }
   0x9   : > { %p38_p3 = scmp.ne.s32.totalorder %s500_s10, %s496_s9  ;;  %p39_p4 = scmp.eq.s32.totalorder %s550_s13, 0 }
   0xa   : > { %s566_s18 = scalar_select %p23_p1, %s504_s11, %s25_s16  }
   0xb   : > { %p568_p5 = por %p33_p2, %p32_p0  ;;  %p572_p6 = por %p39_p4, %p38_p3 }
   0xc   : > { %p83_p7 = scmp.eq.s32.totalorder %s550_s13, 3  ;;  %p89_p8 = scmp.eq.s32.totalorder %s336_s14, 3 }
   0xd   : > { %p367_p9 = scmp.lt.s32.totalorder %s508_s12, 4  ;;  %s112_s23 = sand.u32 1, %s504_s11  }
   0xe   : > { %p578_p10 = por %p83_p7, %p32_p0  ;;  %p582_p11 = por %p89_p8, %p38_p3 }
   0xf   : > { %s353_s24 = sshll.u32 %s508_s12, 5  ;;  %s339_s25 = sshll.u32 %s112_s23, 1 }
  0x10   : > { %s698_s21 = scalar_select %p578_p10, 1, 0 }
  0x11   : > { %s699_s22 = scalar_select %p582_p11, 1, 0 }
  0x12   : > { %s591_s28 = scalar_lea.hbm %s692_s0, %s353_s24  ;;  %s116_s29 = scalar_lea.vmem [#allocation2], %s339_s25 }
  0x13   : > { %s124_s30 = sshll.u32 %s116_s29, 4  ;;  %p595_p12 = pnand %p367_p9, %p568_p5  ;;  %s599_s30 = int_to_ptr.vmem [resolvable:$true] %s124_s30 }
  0x14   : > { %s113_s4 = scalar_lea.sflag [#allocation3], %s112_s23  ;;  %s412_s5 = scalar_lea.hbm %s591_s28, 32 }
  0x15   : > { %p413_p1 = scmp.ne.s32.totalorder %s591_s28, %s412_s5  ;;  %p414_p2 = pneg %p595_p12 }
  0x16   : > { %s417_s8 = scalar_lea.hbm %s692_s0, 128  ;;  %p418_p5 = scmp.lt.u32.totalorder %s591_s28, %s692_s0 }
  0x17   : > { %p415_p3 = pnand %p414_p2, %p413_p1  ;;  %p419_p7 = scmp.lt.u32.totalorder %s417_s8, %s412_s5 }
  0x18   : > { %p421_p9 = scmp.lt.u32.totalorder %s412_s5, %s591_s28 }
  0x19   : > { %p416_p4 = pneg %p415_p3  ;;  %p420_p8 = por %p419_p7, %p418_p5 }
  0x1b   : > { %p422_p13 = por %p421_p9, %p420_p8 }
  0x1d   : > { %p423_p0 = pnand %p422_p13, %p416_p4 }
  0x1f   : > { %426 = shalt.err (!%p423_p0)
}
  0x20   : > { %s427_s17 = scalar_lea.vmem %s599_s30, 32  ;;  %s510_s19 = smov [#allocation2]  }
  0x21   : > { %p428_p1 = scmp.ne.s32.totalorder %s599_s30, %s427_s17  ;;  %s432_s23 = sshll.u32 %s510_s19, 4  ;;  %s433_s23 = int_to_ptr.vmem [resolvable:$false] %s432_s23 }
  0x22   : > { %s434_s24 = scalar_lea.vmem %s433_s23, 64  ;;  %p435_p10 = scmp.lt.s32.totalorder %s599_s30, %s433_s23 }
  0x23   : > { %p430_p3 = pnand %p428_p1, %p414_p2  ;;  %p436_p5 = scmp.lt.s32.totalorder %s434_s24, %s427_s17 }
  0x25   : > { %p431_p11 = pneg %p430_p3  ;;  %p437_p7 = por %p436_p5, %p435_p10 }
  0x27   : > { %p438_p8 = pnand %p437_p7, %p431_p11 }
  0x29   : > { %441 = shalt.err (!%p438_p8)
}
  0x2a   : > { %362 = dma.hbm_to_vmem [thread:$0]  (!%p595_p12), %s591_s28, 32, %s599_s30, %s113_s4  }
  0x2b   : > { %p701_p13 = scmp.lt.s32.totalorder %s508_s12, 5  ;;  %p702_p0 = scmp.ge.s32.totalorder %s508_s12, 1 }
  0x2d   : > { %p130_p2 = pnand %p702_p0, %p701_p13 }
  0x2e   : > { %s633_s25 = sand.u32 (!%p130_p2), 1, %s500_s10  }
  0x2f   : > { %133 = sbr.rel (%p130_p2) target bundleno = 240 (0xf0), region = 28  ;;  %s343_s26 = sshll.u32 (!%p130_p2), %s633_s25, 1 }
  0x30   : > { %s136_s27 = scalar_lea.sflag (!%p130_p2), [#allocation3], %s633_s25  ;;  %s139_s29 = scalar_lea.vmem (!%p130_p2), [#allocation2], %s343_s26 }
  0x36   : > { %487 = dma.done.wait (%p572_p6), %s136_s27, 32  }
  0x37   : > { %489 = vsyncadd (%p572_p6), %s136_s27, 4294967264  ;;  %v511_v0 = vmov 0   ;;  %v163_v1 = vld [vmem:[%s693_s1] sm:$0xf]  ;;  %v170_v2 = vlaneseq  ;;  %v512_v18 = vmov 1966171168  }
  0x38   : > { %403 = vset.pattern.permute.xlu0 %v511_v0  ;;  %v162_v6 = vld [vmem:[%s139_s29] sm:$0x3]  ;;  %v198_v19 = vunpack.c.l.s4 %v512_v18  ;;  %s344_s20 = sshll.u32 %s633_s25, 4  ;;  %s354_s4 = sshll.u32 %s550_s13, 8 }
  0x39   : > { %166 = vperm.xlu0 %403, %v163_v1   ;;  %v171_v3 = vshrl.u32 %v170_v2, 7  ;;  %vm214_vm0 = vcmp.lt.s32.totalorder %v170_v2, 256  ;;  %s159_s3 = scalar_lea.vmem [#allocation5], %s344_s20  ;;  %s649_s8 = scalar_lea.hbm %s694_s2, %s354_s4 }
  0x3a   : > { %v199_v20 = vunpack.c.0.s8 %v198_v19  ;;  %s266_s5 = sshll.u32 %s159_s3, 4  ;;  %s252_s14 = scalar_lea.sflag [#allocation4], %s633_s25  ;;  %s651_s5 = int_to_ptr.vmem [resolvable:$true] %s266_s5 }
  0x3b   : > { %v172_v4 = vsub.s32 0, %v171_v3  ;;  %v176_v5 = vsub.s32 1, %v171_v3  ;;  %s442_s16 = scalar_lea.vmem %s651_s5, 256  ;;  %p703_p10 = scmp.ne.s32.totalorder %s698_s21, 0 }
  0x3c   : > { %v202_v22 = vsub.s32 %v199_v20, %v171_v3  ;;  %p443_p6 = scmp.ne.s32.totalorder %s651_s5, %s442_s16  ;;  %s513_s13 = smov [#allocation5]  }
  0x3d   : > { %v173_v7 = vrot.slane %v162_v6, %v172_v4  ;;  %v177_v8 = vrot.slane %v162_v6, %v176_v5  ;;  %s446_s17 = sshll.u32 %s513_s13, 4  ;;  %s447_s17 = int_to_ptr.vmem [resolvable:$false] %s446_s17 }
  0x3e   : > { %p444_p11 = pnand %p443_p6, %p703_p10  ;;  %s448_s19 = scalar_lea.vmem %s447_s17, 512 }
  0x3f   : > { %p449_p4 = scmp.lt.s32.totalorder %s651_s5, %s447_s17  ;;  %p450_p9 = scmp.lt.s32.totalorder %s448_s19, %s442_s16 }
  0x40   : > { %p445_p12 = pneg %p444_p11 }
  0x41   : > { %p451_p1 = por %p450_p9, %p449_p4 }
  0x43   : > { %p452_p3 = pnand %p451_p1, %p445_p12 }
  0xb8   : > { %v167_v9 = vpop.permute.xlu0 %166 }
  0xb9   : > { %v180_v10 = vsub.f32 %v167_v9, %v173_v7  ;;  %v181_v11 = vsub.f32 %v167_v9, %v177_v8 }
  0xbb   : > { %v345_v12 = vmul.f32 -1.442695, %v180_v10  ;;  %v346_v13 = vmul.f32 -1.442695, %v181_v11 }
  0xbd   : > { %404 = vpow2.f32 %v345_v12 }
  0xbe   : > { %406 = vpow2.f32 %v346_v13 }
  0xc7   : > { %v405_v14 = vpop.eup %404 }
  0xc8   : > { %v407_v15 = vpop.eup %406  ;;  %v188_v16 = vadd.f32 1.0, %v405_v14 }
  0xc9   : > { %v189_v17 = vadd.f32 1.0, %v407_v15 }
  0xca   : > { %408 = vrcp.f32 %v188_v16 }
  0xcb   : > { %410 = vrcp.f32 %v189_v17 }
  0xd4   : > { %v409_v21 = vpop.eup %408 }
  0xd5   : > { %v411_v23 = vpop.eup %410  ;;  %v226_v24 = vsub.f32 1.0, %v409_v21  ;;  %v218_v25 = vrot.slane %v409_v21, 7 }
  0xd6   : > { %v196_v26 = vcombine.low %v409_v21, %v411_v23  ;;  %v227_v27 = vsub.f32 1.0, %v411_v23  ;;  %v219_v28 = vrot.slane %v411_v23, 7 }
  0xd7   : > { %v222_v29 = vsub.f32 %v409_v21, %v218_v25 }
  0xd8   : > { %v203_v30 = vrot.slane %v196_v26, %v202_v22  ;;  %v230_v31 = vcombine.low %v226_v24, %v227_v27  ;;  %v223_v32 = vsub.f32 %v411_v23, %v219_v28 }
  0xd9   : > { %224 = vst [vmem:[%s159_s3] sm:$0xe] %v222_v29 }
  0xda   : > { %v210_v33 = vrot.slane %v203_v30, %v202_v22  ;;  %v237_v34 = vrot.slane %v230_v31, %v202_v22  ;;  %225 = vst [vmem:[%s159_s3 + $0x8] sm:$0xe] %v223_v32 }
  0xdc   : > { %v238_v35 = vcombine.high %v237_v34, %v237_v34  ;;  %216 = vst.msk [vmem:[%s159_s3] ss:$8 sm:$0x3] %vm214_vm0, %v210_v33 }
  0xde   : > { %v245_v36 = vrot.slane %v238_v35, %v202_v22 }
  0xe0   : > { %v246_v37 = vcombine.high %v245_v36, %v245_v36 }
  0xe2   : > { %347 = vst.msk [vmem:[%s159_s3 + $0x4] ss:$8 sm:$0x3] %vm214_vm0, %v246_v37 }
  0xe3   : > { %455 = shalt.err (!%p452_p3)
}
  0xe4   : > { %s456_s23 = scalar_lea.hbm %s649_s8, 256  ;;  %s460_s26 = scalar_lea.hbm %s694_s2, 1024 }
  0xe5   : > { %p457_p5 = scmp.ne.s32.totalorder %s649_s8, %s456_s23  ;;  %p461_p13 = scmp.lt.u32.totalorder %s649_s8, %s694_s2 }
  0xe6   : > { %p462_p0 = scmp.lt.u32.totalorder %s460_s26, %s456_s23  ;;  %p464_p6 = scmp.lt.u32.totalorder %s456_s23, %s649_s8 }
  0xe7   : > { %p458_p7 = pnand %p457_p5, %p703_p10 }
  0xe8   : > { %p463_p2 = por %p462_p0, %p461_p13 }
  0xe9   : > { %p459_p8 = pneg %p458_p7 }
  0xea   : > { %p465_p11 = por %p464_p6, %p463_p2 }
  0xec   : > { %p466_p12 = pnand %p465_p11, %p459_p8 }
  0xee   : > { %469 = shalt.err (!%p466_p12)
}
  0xef   : > { %357 = dma.vmem_to_hbm [thread:$0]  (%p703_p10), %s651_s5, 256, %s649_s8, %s252_s14  }
  0xf0 PF: > { %p368_p4 = scmp.ge.s32.totalorder %s508_s12, 2  ;;  %s278_s28 = sand.u32 1, %s496_s9  }
  0xf1   : > { %p704_p9 = scmp.ne.s32.totalorder %s699_s22, 0  ;;  %s279_s30 = scalar_lea.sflag [#allocation4], %s278_s28 }
  0xf3   : > { %p364_p1 = pnand %p368_p4, %p704_p9 }
  0xf5   : > { %491 = dma.done.wait (!%p364_p1), %s279_s30, 256  }
  0xf6   : > { %493 = vsyncadd (!%p364_p1), %s279_s30, 4294967040  ;;  %p15_p3 = scmp.ge.s32.totalorder %s554_s15, 6   ;;  %s705_s9 = smov %s500_s10 }
  0xf7   : > { %s706_s10 = smov %s504_s11  ;;  %s707_s11 = smov %s566_s18 }
  0xf8   : > { %s708_s12 = smov %s554_s15  ;;  %17 = sbr.rel (!%p15_p3) target bundleno = 5 (0x5), region = 74 }
  0xff   :  { %284 = vsyncpa [#allocation3], 1 }
 0x100   :  { %286 = vsyncpa [#allocation3 + $0x1], 1 }
 0x101   :  { %287 = vsyncpa [#allocation4], 1 }
 0x102   :  { %289 = vsyncpa [#allocation4 + $0x1], 1 }

</bundles_post_ra>
